<compile_context>
chip_gen: v7x
topology: tpu7x:2x2x1
jax: 0.10.0
libtpu: 0.0.40
codegen_flags: <defaults>
</compile_context>

<pallas_src>
import functools
import math

import jax
import jax.numpy as jnp
from jax.experimental import pallas as pl
from jax.experimental.pallas import tpu as pltpu


def _round_up(x, m):
    return ((x + m - 1) // m) * m


def _pad2d(a, rows, cols):
    r, c = a.shape
    if r == rows and c == cols:
        return a
    return jnp.pad(a, ((0, rows - r), (0, cols - c)))


def _vmem_capacity_bytes():
    """Generation-aware VMEM capacity; conservative fallback (v7x per-TC 64 MiB)."""
    try:
        return int(pltpu.get_tpu_info().vmem_capacity_bytes)
    except Exception:
        return 64 * 1024 * 1024


def _mlp_kernel(x_ref, *refs, n_layers, bias_offsets, bias_sizes):
    """Fused MLP for one tile of rows.

    refs = (w1, ..., wL, bias_cat, o_ref). Weights are bf16 [in_p, out_p] and
    fully resident in VMEM; the concatenated f32 bias row is sliced with static
    offsets. Matmuls accumulate in f32; bias/ReLU in f32; the activation that
    feeds the next matmul is re-cast to bf16.
    """
    o_ref = refs[-1]
    bias_ref = refs[-2]
    h = x_ref[...]                                       # bf16 [tm, K_p]
    for i in range(n_layers):
        w = refs[i][...]                                 # bf16 [in_p, out_p]
        off, sz = bias_offsets[i], bias_sizes[i]         # static Python ints
        b = bias_ref[:, off:off + sz]                    # f32 [1, out_p]
        acc = jnp.dot(h, w, preferred_element_type=jnp.float32) + b
        if i + 1 < n_layers:
            acc = jnp.maximum(acc, 0.0)                  # ReLU in f32
            h = acc.astype(jnp.bfloat16)                 # bf16 between layers
        else:
            h = acc
    o_ref[...] = h.astype(o_ref.dtype)


def init_fully_connected_params(key, input_size, layout):
    """Deterministic PyTorch-style Linear init: U(-1/sqrt(in), 1/sqrt(in)).

    Returns params in PyTorch layout: list of (W [out, in], b [out]), f32.
    """
    params = []
    prev = input_size
    for fc_size in layout:
        key, kw, kb = jax.random.split(key, 3)
        bound = 1.0 / math.sqrt(prev)
        w = jax.random.uniform(
            kw, (fc_size, prev), jnp.float32, minval=-bound, maxval=bound
        )
        b = jax.random.uniform(
            kb, (fc_size,), jnp.float32, minval=-bound, maxval=bound
        )
        params.append((w, b))
        prev = fc_size
    return params


def prepare_params(params, input_size):
    """One-time prep (at init, NOT per forward):
    transpose PyTorch weights to [in, out], zero-pad every dim to a multiple of
    128 (lane-dense, numerically neutral through matmul/bias/ReLU), cast weights
    to bf16, and concatenate all biases (f32) into a single row."""
    weights = []
    bias_parts = []
    bias_offsets = []
    bias_sizes = []
    prev_p = _round_up(input_size, 128)
    off = 0
    for (w, b) in params:
        out_size, _ = w.shape
        out_p = _round_up(out_size, 128)
        w_t = _pad2d(w.T.astype(jnp.float32), prev_p, out_p).astype(jnp.bfloat16)
        b_p = _pad2d(b.reshape(1, -1).astype(jnp.float32), 1, out_p)
        weights.append(w_t)                  # bf16 [in_p, out_p]
        bias_parts.append(b_p)               # f32  [1, out_p]
        bias_offsets.append(off)
        bias_sizes.append(out_p)
        off += out_p
        prev_p = out_p
    return {
        "weights": weights,
        "bias_cat": jnp.concatenate(bias_parts, axis=1),   # f32 [1, sum(out_p)]
        "bias_offsets": tuple(bias_offsets),
        "bias_sizes": tuple(bias_sizes),
    }


def _build_call(prepped, tm, Mp, single_buffer_weights, vmem_limit_bytes):
    weights = prepped["weights"]
    bias_cat = prepped["bias_cat"]
    K_p = weights[0].shape[0]
    N_p = weights[-1].shape[1]
    n_layers = len(weights)

    def const_spec(shape):
        if single_buffer_weights:
            # Grid-invariant operand: one VMEM buffer is enough (default is 2).
            return pl.BlockSpec(shape, lambda i: (0, 0),
                                pipeline_mode=pl.Buffered(1))
        return pl.BlockSpec(shape, lambda i: (0, 0))

    in_specs = [pl.BlockSpec((tm, K_p), lambda i: (i, 0))]
    in_specs += [const_spec(w.shape) for w in weights]
    in_specs.append(const_spec(bias_cat.shape))

    kernel = functools.partial(
        _mlp_kernel,
        n_layers=n_layers,
        bias_offsets=prepped["bias_offsets"],
        bias_sizes=prepped["bias_sizes"],
    )

    return pl.pallas_call(
        kernel,
        out_shape=jax.ShapeDtypeStruct((Mp, N_p), jnp.float32),
        grid_spec=pltpu.PrefetchScalarGridSpec(
            num_scalar_prefetch=0,
            grid=(Mp // tm,),
            in_specs=in_specs,
            out_specs=pl.BlockSpec((tm, N_p), lambda i: (i, 0)),
        ),
        compiler_params=pltpu.CompilerParams(
            dimension_semantics=("parallel",),
            vmem_limit_bytes=vmem_limit_bytes,
        ),
    )


def fully_connected_forward(x, prepped, out_features):
    """x: [B, C, H, W]; prepped from prepare_params()."""
    B = x.shape[0]
    h = x.reshape(B, -1)                      # Flatten (torch.nn.Flatten order)
    M = h.shape[0]

    weights = prepped["weights"]
    K_p = weights[0].shape[0]
    N_p = weights[-1].shape[1]
    max_out_p = max(w.shape[1] for w in weights)

    # Row tiling: tm=128 by default (matches v5e 4x128 MXU height, small tile
    # footprint); tm=256 only when M8 >= 512 so the grid has >= 2 blocks for any
    # M8 >= 256 (both v7x TensorCores busy under "parallel").
    M8 = _round_up(max(M, 1), 8)
    if M8 >= 512:
        tm = 256
    elif M8 >= 128:
        tm = 128
    else:
        tm = M8
    Mp = _round_up(M8, tm)
    xp = _pad2d(h.astype(jnp.float32), Mp, K_p).astype(jnp.bfloat16)

    # Generation-aware VMEM budget: bf16 weights (single-buffered) + f32 bias row
    # + double-buffered bf16 x tile and f32 out tile + live f32 activations
    # (~2 layers' worth) + headroom for Mosaic internal scratch.
    w_bytes = sum(w.size * 2 for w in weights)
    b_bytes = prepped["bias_cat"].size * 4
    tile_bytes = 2 * (tm * K_p * 2) + 2 * (tm * N_p * 4)
    act_bytes = 2 * tm * max_out_p * 4
    budget = w_bytes + b_bytes + tile_bytes + act_bytes
    vmem_cap = _vmem_capacity_bytes()
    assert budget < int(0.75 * vmem_cap), (
        f"fused MLP needs ~{budget >> 20} MiB VMEM but only {vmem_cap >> 20} MiB "
        "is available; needs a streaming per-layer path"
    )  # TODO(synk): add a K/N-streaming fallback path for very large layouts.

    vmem_limit = int(min(max(int(budget * 1.5) + (4 << 20), 32 << 20),
                         int(0.9 * vmem_cap)))

    try:
        call = _build_call(prepped, tm, Mp, True, vmem_limit)
        out = call(xp, *weights, prepped["bias_cat"])
    except Exception:
        # Fallback if this JAX build rejects Buffered(1) on input specs.
        call = _build_call(prepped, tm, Mp, False, vmem_limit)
        out = call(xp, *weights, prepped["bias_cat"])

    return out[:M, :out_features]


if __name__ == "__main__":
    key = jax.random.PRNGKey(0)
    kx, kp = jax.random.split(key)

    # Small shapes consistent with the module: batch=2, channels=4, spatial=16.
    B, C, H, W = 2, 4, 16, 16
    input_size = C * H * W          # 1024 (Flatten output)
    layout = [64, 32, 10]           # hidden layers + output

    x = jax.random.normal(kx, (B, C, H, W), dtype=jnp.float32)
    params = init_fully_connected_params(kp, input_size, layout)
    prepped = prepare_params(params, input_size)   # one-time: transpose+pad+bf16

    out = fully_connected_forward(x, prepped, layout[-1])
    out = jax.block_until_ready(out)
    assert out.shape == (B, layout[-1])

    # Reference 1: same math as the kernel (bf16 operands, f32 accumulate).
    h = x.reshape(B, -1)
    for i, (w, b) in enumerate(params):
        h = jnp.dot(h.astype(jnp.bfloat16), w.T.astype(jnp.bfloat16),
                    preferred_element_type=jnp.float32) + b
        if i + 1 < len(params):
            h = jnp.maximum(h, 0.0)
    assert jnp.allclose(out, h, atol=2e-3, rtol=2e-3), "mismatch vs bf16 reference"

    # Reference 2: full-f32 math (loose tolerance; bf16 weights are the only delta).
    h32 = x.reshape(B, -1)
    for i, (w, b) in enumerate(params):
        h32 = h32 @ w.T + b
        if i + 1 < len(params):
            h32 = jnp.maximum(h32, 0.0)
    assert jnp.allclose(out, h32, atol=5e-2, rtol=5e-2), "mismatch vs f32 reference"

    print("KERNEL_OK")
</pallas_src>

<mosaic_0001>
module attributes {stable_mosaic.version = 11 : i64} {
  func.func @_mlp_kernel(%arg0: i32, %arg1: memref<8x1024xbf16, #tpu.memory_space<vmem>>, %arg2: memref<1024x128xbf16, #tpu.memory_space<vmem>>, %arg3: memref<128x128xbf16, #tpu.memory_space<vmem>>, %arg4: memref<128x128xbf16, #tpu.memory_space<vmem>>, %arg5: memref<1x384xf32, #tpu.memory_space<vmem>>, %arg6: memref<8x128xf32, #tpu.memory_space<vmem>>) attributes {dimension_semantics = [#tpu.dimension_semantics<parallel>], iteration_bounds = array<i64: 1>, scalar_prefetch = 0 : i64, scratch_operands = 0 : i64, tpu.core_type = #tpu.core_type<tc>, window_params = [{transform_indices = @transform_0, window_bounds = array<i64: 8, 1024>}, {pipeline_mode = #tpu.pipeline_mode<synchronous>, transform_indices = @transform_1, window_bounds = array<i64: 1024, 128>}, {pipeline_mode = #tpu.pipeline_mode<synchronous>, transform_indices = @transform_2, window_bounds = array<i64: 128, 128>}, {pipeline_mode = #tpu.pipeline_mode<synchronous>, transform_indices = @transform_3, window_bounds = array<i64: 128, 128>}, {pipeline_mode = #tpu.pipeline_mode<synchronous>, transform_indices = @transform_4, window_bounds = array<i64: 1, 384>}, {transform_indices = @transform_5, window_bounds = array<i64: 8, 128>}]} {
    %c0 = arith.constant 0 : index
    %c0_0 = arith.constant 0 : index
    %0 = vector.load %arg1[%c0, %c0_0] : memref<8x1024xbf16, #tpu.memory_space<vmem>>, vector<8x1024xbf16>
    %c0_1 = arith.constant 0 : index
    %c0_2 = arith.constant 0 : index
    %1 = vector.load %arg2[%c0_1, %c0_2] : memref<1024x128xbf16, #tpu.memory_space<vmem>>, vector<1024x128xbf16>
    %c0_3 = arith.constant 0 : index
    %c0_4 = arith.constant 0 : index
    %2 = vector.load %arg5[%c0_3, %c0_4] : memref<1x384xf32, #tpu.memory_space<vmem>>, vector<1x128xf32>
    %cst = arith.constant dense<0.000000e+00> : vector<8x128xf32>
    %3 = tpu.matmul %0, %1, %cst {dimension_numbers = #tpu.dot_dimension_numbers<[1], [0], [0], [1], [0, 0, 1, 1], [], []>} : vector<8x1024xbf16>, vector<1024x128xbf16>, vector<8x128xf32> -> vector<8x128xf32>
    %4 = vector.broadcast %2 : vector<1x128xf32> to vector<8x128xf32>
    %5 = arith.addf %3, %4 : vector<8x128xf32>
    %cst_5 = arith.constant 0.000000e+00 : f32
    %6 = vector.broadcast %cst_5 : f32 to vector<8x128xf32>
    %7 = arith.maximumf %5, %6 : vector<8x128xf32>
    %8 = arith.truncf %7 : vector<8x128xf32> to vector<8x128xbf16>
    %c0_6 = arith.constant 0 : index
    %c0_7 = arith.constant 0 : index
    %9 = vector.load %arg3[%c0_6, %c0_7] : memref<128x128xbf16, #tpu.memory_space<vmem>>, vector<128x128xbf16>
    %c0_8 = arith.constant 0 : index
    %c128 = arith.constant 128 : index
    %10 = vector.load %arg5[%c0_8, %c128] : memref<1x384xf32, #tpu.memory_space<vmem>>, vector<1x128xf32>
    %cst_9 = arith.constant dense<0.000000e+00> : vector<8x128xf32>
    %11 = tpu.matmul %8, %9, %cst_9 {dimension_numbers = #tpu.dot_dimension_numbers<[1], [0], [0], [1], [0, 0, 1, 1], [], []>} : vector<8x128xbf16>, vector<128x128xbf16>, vector<8x128xf32> -> vector<8x128xf32>
    %12 = vector.broadcast %10 : vector<1x128xf32> to vector<8x128xf32>
    %13 = arith.addf %11, %12 : vector<8x128xf32>
    %cst_10 = arith.constant 0.000000e+00 : f32
    %14 = vector.broadcast %cst_10 : f32 to vector<8x128xf32>
    %15 = arith.maximumf %13, %14 : vector<8x128xf32>
    %16 = arith.truncf %15 : vector<8x128xf32> to vector<8x128xbf16>
    %c0_11 = arith.constant 0 : index
    %c0_12 = arith.constant 0 : index
    %17 = vector.load %arg4[%c0_11, %c0_12] : memref<128x128xbf16, #tpu.memory_space<vmem>>, vector<128x128xbf16>
    %c0_13 = arith.constant 0 : index
    %c256 = arith.constant 256 : index
    %18 = vector.load %arg5[%c0_13, %c256] : memref<1x384xf32, #tpu.memory_space<vmem>>, vector<1x128xf32>
    %cst_14 = arith.constant dense<0.000000e+00> : vector<8x128xf32>
    %19 = tpu.matmul %16, %17, %cst_14 {dimension_numbers = #tpu.dot_dimension_numbers<[1], [0], [0], [1], [0, 0, 1, 1], [], []>} : vector<8x128xbf16>, vector<128x128xbf16>, vector<8x128xf32> -> vector<8x128xf32>
    %20 = vector.broadcast %18 : vector<1x128xf32> to vector<8x128xf32>
    %21 = arith.addf %19, %20 : vector<8x128xf32>
    %c0_15 = arith.constant 0 : index
    %c0_16 = arith.constant 0 : index
    %22 = vector.load %arg6[%c0_15, %c0_16] : memref<8x128xf32, #tpu.memory_space<vmem>>, vector<8x128xf32>
    tpu.vector_store %arg6[%c0_15, %c0_16], %21 {strides = array<i32>} : memref<8x128xf32, #tpu.memory_space<vmem>>, vector<8x128xf32>,
    return
  }
  func.func @transform_0(%arg0: i32) -> (i32, i32) {
    %c0_i32 = arith.constant 0 : i32
    %c0_i32_0 = arith.constant 0 : i32
    return %arg0, %c0_i32 : i32, i32
  }
  func.func @transform_1(%arg0: i32) -> (i32, i32) {
    %c0_i32 = arith.constant 0 : i32
    %c0_i32_0 = arith.constant 0 : i32
    %c0_i32_1 = arith.constant 0 : i32
    return %c0_i32, %c0_i32_0 : i32, i32
  }
  func.func @transform_2(%arg0: i32) -> (i32, i32) {
    %c0_i32 = arith.constant 0 : i32
    %c0_i32_0 = arith.constant 0 : i32
    %c0_i32_1 = arith.constant 0 : i32
    return %c0_i32, %c0_i32_0 : i32, i32
  }
  func.func @transform_3(%arg0: i32) -> (i32, i32) {
    %c0_i32 = arith.constant 0 : i32
    %c0_i32_0 = arith.constant 0 : i32
    %c0_i32_1 = arith.constant 0 : i32
    return %c0_i32, %c0_i32_0 : i32, i32
  }
  func.func @transform_4(%arg0: i32) -> (i32, i32) {
    %c0_i32 = arith.constant 0 : i32
    %c0_i32_0 = arith.constant 0 : i32
    %c0_i32_1 = arith.constant 0 : i32
    return %c0_i32, %c0_i32_0 : i32, i32
  }
  func.func @transform_5(%arg0: i32) -> (i32, i32) {
    %c0_i32 = arith.constant 0 : i32
    %c0_i32_0 = arith.constant 0 : i32
    return %arg0, %c0_i32 : i32, i32
  }
}

module attributes {stable_mosaic.version = 11 : i64} {
  func.func @_mlp_kernel(%arg0: i32, %arg1: memref<8x1024xbf16, #tpu.memory_space<vmem>>, %arg2: memref<1024x128xbf16, #tpu.memory_space<vmem>>, %arg3: memref<128x128xbf16, #tpu.memory_space<vmem>>, %arg4: memref<128x128xbf16, #tpu.memory_space<vmem>>, %arg5: memref<1x384xf32, #tpu.memory_space<vmem>>, %arg6: memref<8x128xf32, #tpu.memory_space<vmem>>) attributes {dimension_semantics = [#tpu.dimension_semantics<parallel>], iteration_bounds = array<i64: 1>, scalar_prefetch = 0 : i64, scratch_operands = 0 : i64, tpu.core_type = #tpu.core_type<tc>, window_params = [{transform_indices = @transform_0, window_bounds = array<i64: 8, 1024>}, {pipeline_mode = #tpu.pipeline_mode<synchronous>, transform_indices = @transform_1, window_bounds = array<i64: 1024, 128>}, {pipeline_mode = #tpu.pipeline_mode<synchronous>, transform_indices = @transform_2, window_bounds = array<i64: 128, 128>}, {pipeline_mode = #tpu.pipeline_mode<synchronous>, transform_indices = @transform_3, window_bounds = array<i64: 128, 128>}, {pipeline_mode = #tpu.pipeline_mode<synchronous>, transform_indices = @transform_4, window_bounds = array<i64: 1, 384>}, {transform_indices = @transform_5, window_bounds = array<i64: 8, 128>}]} {
    %c0 = arith.constant 0 : index
    %c0_0 = arith.constant 0 : index
    %0 = vector.load %arg1[%c0, %c0_0] : memref<8x1024xbf16, #tpu.memory_space<vmem>>, vector<8x1024xbf16>
    %c0_1 = arith.constant 0 : index
    %c0_2 = arith.constant 0 : index
    %1 = vector.load %arg2[%c0_1, %c0_2] : memref<1024x128xbf16, #tpu.memory_space<vmem>>, vector<1024x128xbf16>
    %c0_3 = arith.constant 0 : index
    %c0_4 = arith.constant 0 : index
    %2 = vector.load %arg5[%c0_3, %c0_4] : memref<1x384xf32, #tpu.memory_space<vmem>>, vector<1x128xf32>
    %cst = arith.constant dense<0.000000e+00> : vector<8x128xf32>
    %3 = tpu.matmul %0, %1, %cst {dimension_numbers = #tpu.dot_dimension_numbers<[1], [0], [0], [1], [0, 0, 1, 1], [], []>} : vector<8x1024xbf16>, vector<1024x128xbf16>, vector<8x128xf32> -> vector<8x128xf32>
    %4 = vector.broadcast %2 : vector<1x128xf32> to vector<8x128xf32>
    %5 = arith.addf %3, %4 : vector<8x128xf32>
    %cst_5 = arith.constant 0.000000e+00 : f32
    %6 = vector.broadcast %cst_5 : f32 to vector<8x128xf32>
    %7 = arith.maximumf %5, %6 : vector<8x128xf32>
    %8 = arith.truncf %7 : vector<8x128xf32> to vector<8x128xbf16>
    %c0_6 = arith.constant 0 : index
    %c0_7 = arith.constant 0 : index
    %9 = vector.load %arg3[%c0_6, %c0_7] : memref<128x128xbf16, #tpu.memory_space<vmem>>, vector<128x128xbf16>
    %c0_8 = arith.constant 0 : index
    %c128 = arith.constant 128 : index
    %10 = vector.load %arg5[%c0_8, %c128] : memref<1x384xf32, #tpu.memory_space<vmem>>, vector<1x128xf32>
    %cst_9 = arith.constant dense<0.000000e+00> : vector<8x128xf32>
    %11 = tpu.matmul %8, %9, %cst_9 {dimension_numbers = #tpu.dot_dimension_numbers<[1], [0], [0], [1], [0, 0, 1, 1], [], []>} : vector<8x128xbf16>, vector<128x128xbf16>, vector<8x128xf32> -> vector<8x128xf32>
    %12 = vector.broadcast %10 : vector<1x128xf32> to vector<8x128xf32>
    %13 = arith.addf %11, %12 : vector<8x128xf32>
    %cst_10 = arith.constant 0.000000e+00 : f32
    %14 = vector.broadcast %cst_10 : f32 to vector<8x128xf32>
    %15 = arith.maximumf %13, %14 : vector<8x128xf32>
    %16 = arith.truncf %15 : vector<8x128xf32> to vector<8x128xbf16>
    %c0_11 = arith.constant 0 : index
    %c0_12 = arith.constant 0 : index
    %17 = vector.load %arg4[%c0_11, %c0_12] : memref<128x128xbf16, #tpu.memory_space<vmem>>, vector<128x128xbf16>
    %c0_13 = arith.constant 0 : index
    %c256 = arith.constant 256 : index
    %18 = vector.load %arg5[%c0_13, %c256] : memref<1x384xf32, #tpu.memory_space<vmem>>, vector<1x128xf32>
    %cst_14 = arith.constant dense<0.000000e+00> : vector<8x128xf32>
    %19 = tpu.matmul %16, %17, %cst_14 {dimension_numbers = #tpu.dot_dimension_numbers<[1], [0], [0], [1], [0, 0, 1, 1], [], []>} : vector<8x128xbf16>, vector<128x128xbf16>, vector<8x128xf32> -> vector<8x128xf32>
    %20 = vector.broadcast %18 : vector<1x128xf32> to vector<8x128xf32>
    %21 = arith.addf %19, %20 : vector<8x128xf32>
    %c0_15 = arith.constant 0 : index
    %c0_16 = arith.constant 0 : index
    %22 = vector.load %arg6[%c0_15, %c0_16] : memref<8x128xf32, #tpu.memory_space<vmem>>, vector<8x128xf32>
    tpu.vector_store %arg6[%c0_15, %c0_16], %21 {strides = array<i32>} : memref<8x128xf32, #tpu.memory_space<vmem>>, vector<8x128xf32>,
    return
  }
  func.func @transform_0(%arg0: i32) -> (i32, i32) {
    %c0_i32 = arith.constant 0 : i32
    %c0_i32_0 = arith.constant 0 : i32
    return %arg0, %c0_i32 : i32, i32
  }
  func.func @transform_1(%arg0: i32) -> (i32, i32) {
    %c0_i32 = arith.constant 0 : i32
    %c0_i32_0 = arith.constant 0 : i32
    %c0_i32_1 = arith.constant 0 : i32
    return %c0_i32, %c0_i32_0 : i32, i32
  }
  func.func @transform_2(%arg0: i32) -> (i32, i32) {
    %c0_i32 = arith.constant 0 : i32
    %c0_i32_0 = arith.constant 0 : i32
    %c0_i32_1 = arith.constant 0 : i32
    return %c0_i32, %c0_i32_0 : i32, i32
  }
  func.func @transform_3(%arg0: i32) -> (i32, i32) {
    %c0_i32 = arith.constant 0 : i32
    %c0_i32_0 = arith.constant 0 : i32
    %c0_i32_1 = arith.constant 0 : i32
    return %c0_i32, %c0_i32_0 : i32, i32
  }
  func.func @transform_4(%arg0: i32) -> (i32, i32) {
    %c0_i32 = arith.constant 0 : i32
    %c0_i32_0 = arith.constant 0 : i32
    %c0_i32_1 = arith.constant 0 : i32
    return %c0_i32, %c0_i32_0 : i32, i32
  }
  func.func @transform_5(%arg0: i32) -> (i32, i32) {
    %c0_i32 = arith.constant 0 : i32
    %c0_i32_0 = arith.constant 0 : i32
    return %arg0, %c0_i32 : i32, i32
  }
}

</mosaic_0001>

<bundles_post_ra>
// kernel: tpu_custom_call.1
= control target key start
LH: loop header
LB: loop body
LE: loop exit
PB: predicated region body
PF: predicated region fallthrough
CT: control target
= control target key end

     0   :  { %10 = vsyncpa [#allocation3], 0  ;;  %s1617_s0 = inlined_call_operand.hbm [shape: bf16[8,1024], index: 0, kind: input, shape index: {}]   ;;  %s1618_s1 = inlined_call_operand.hbm [shape: bf16[1024,128], index: 1, kind: input, shape index: {}]   ;;  %s1619_s2 = inlined_call_operand.hbm [shape: bf16[128,128], index: 2, kind: input, shape index: {}]   ;;  %s1620_s3 = inlined_call_operand.hbm [shape: bf16[128,128], index: 3, kind: input, shape index: {}]   ;;  %s1621_s4 = inlined_call_operand.vmem [shape: f32[1,384], index: 4, kind: input, shape index: {}]   ;;  %s1622_s5 = inlined_call_operand.hbm [shape: f32[8,128], index: 5, kind: output, shape index: {}]  }
   0x1   :  { %11 = vsyncpa [#allocation6], 0 }
   0x2   :  { %12 = vsyncpa [#allocation9], 0 }
   0x3   :  { %13 = vsyncpa [#allocation4], 0  ;;  %s1482_s18 = smov [#allocation5]   ;;  %s1364_s22 = scalar_lea.hbm %s1618_s1, 8192 }
   0x4   :  { %s29_s19 = sshll.u32 %s1482_s18, 4  ;;  %p1365_p0 = scmp.ne.s32.totalorder %s1618_s1, %s1364_s22  ;;  %s30_s19 = int_to_ptr.vmem [resolvable:$true] %s29_s19 }
   0x5   :  { %p1368_p1 = scmp.lt.u32.totalorder %s1364_s22, %s1618_s1 }
   0x7   :  { %p1370_p2 = pnand %p1368_p1, %p1365_p0 }
   0x9   :  { %1373 = shalt.err (!%p1370_p2)
}
   0xa   :  { %s1374_s27 = scalar_lea.vmem %s30_s19, 8192  ;;  %p1379_p4 = scmp.lt.s32.totalorder %s30_s19, %s30_s19 }
   0xb   :  { %p1375_p3 = scmp.ne.s32.totalorder %s30_s19, %s1374_s27  ;;  %p1380_p5 = scmp.lt.s32.totalorder %s1374_s27, %s1374_s27 }
   0xd   :  { %p1381_p6 = por %p1380_p5, %p1379_p4 }
   0xf   :  { %p1382_p7 = pnand %p1381_p6, %p1375_p3 }
  0x11   :  { %1385 = shalt.err (!%p1382_p7)
}
  0x12   :  { %s1483_s28 = smov 64   ;;  %s1484_s29 = smov 4  }
  0x13   :  { %35 = dma.hbm_to_vmem [thread:$0]  %s1618_s1, 8192, %s30_s19, [#allocation6], %s1483_s28, %s1483_s28, %s1484_s29  }
  0x14   :  { %s1485_s7 = smov [#allocation2]   ;;  %s1486_s9 = smov [#allocation7]  }
  0x15   :  { %s20_s8 = sshll.u32 %s1485_s7, 4  ;;  %s41_s10 = sshll.u32 %s1486_s9, 4  ;;  %s21_s8 = int_to_ptr.vmem [resolvable:$true] %s20_s8  ;;  %s42_s10 = int_to_ptr.vmem [resolvable:$true] %s41_s10 }
  0x16   :  { %s1386_s13 = scalar_lea.hbm %s1617_s0, 512 }
  0x17   :  { %p1387_p8 = scmp.ne.s32.totalorder %s1617_s0, %s1386_s13  ;;  %p1390_p9 = scmp.lt.u32.totalorder %s1386_s13, %s1617_s0 }
  0x19   :  { %p1392_p10 = pnand %p1390_p9, %p1387_p8 }
  0x1b   :  { %1395 = shalt.err (!%p1392_p10)
}
  0x1c   :  { %s1396_s1 = scalar_lea.vmem %s21_s8, 512  ;;  %p1401_p12 = scmp.lt.s32.totalorder %s21_s8, %s21_s8 }
  0x1d   :  { %p1397_p11 = scmp.ne.s32.totalorder %s21_s8, %s1396_s1  ;;  %p1402_p13 = scmp.lt.s32.totalorder %s1396_s1, %s1396_s1 }
  0x1f   :  { %p1403_p0 = por %p1402_p13, %p1401_p12 }
  0x21   :  { %p1404_p1 = pnand %p1403_p0, %p1397_p11 }
  0x23   :  { %1407 = shalt.err (!%p1404_p1)
}
  0x24   :  { %23 = dma.hbm_to_vmem [thread:$0]  %s1617_s0, 512, %s21_s8, [#allocation3]  }
  0x25   :  { %s1408_s22 = scalar_lea.hbm %s1619_s2, 1024 }
  0x26   :  { %p1409_p2 = scmp.ne.s32.totalorder %s1619_s2, %s1408_s22  ;;  %p1412_p3 = scmp.lt.u32.totalorder %s1408_s22, %s1619_s2 }
  0x28   :  { %p1414_p4 = pnand %p1412_p3, %p1409_p2 }
  0x2a   :  { %1417 = shalt.err (!%p1414_p4)
}
  0x2b   :  { %s1418_s27 = scalar_lea.vmem %s42_s10, 1024  ;;  %p1423_p6 = scmp.lt.s32.totalorder %s42_s10, %s42_s10 }
  0x2c   :  { %p1419_p5 = scmp.ne.s32.totalorder %s42_s10, %s1418_s27  ;;  %p1424_p7 = scmp.lt.s32.totalorder %s1418_s27, %s1418_s27 }
  0x2e   :  { %p1425_p8 = por %p1424_p7, %p1423_p6 }
  0x30   :  { %p1426_p9 = pnand %p1425_p8, %p1419_p5 }
  0x32   :  { %1429 = shalt.err (!%p1426_p9)
}
  0x33   :  { %47 = dma.hbm_to_vmem [thread:$0]  %s1619_s2, 1024, %s42_s10, [#allocation6], %s1483_s28, %s1483_s28, %s1484_s29  }
  0x34   :  { %s1487_s6 = smov [#allocation8]   ;;  %s1430_s11 = scalar_lea.hbm %s1620_s3, 1024 }
  0x35   :  { %s53_s7 = sshll.u32 %s1487_s6, 4  ;;  %p1431_p10 = scmp.ne.s32.totalorder %s1620_s3, %s1430_s11  ;;  %s54_s7 = int_to_ptr.vmem [resolvable:$true] %s53_s7 }
  0x36   :  { %p1434_p11 = scmp.lt.u32.totalorder %s1430_s11, %s1620_s3 }
  0x38   :  { %p1436_p12 = pnand %p1434_p11, %p1431_p10 }
  0x3a   :  { %1439 = shalt.err (!%p1436_p12)
}
  0x3b   :  { %s1440_s16 = scalar_lea.vmem %s54_s7, 1024  ;;  %p1445_p0 = scmp.lt.s32.totalorder %s54_s7, %s54_s7 }
  0x3c   :  { %p1441_p13 = scmp.ne.s32.totalorder %s54_s7, %s1440_s16  ;;  %p1446_p1 = scmp.lt.s32.totalorder %s1440_s16, %s1440_s16 }
  0x3e   :  { %p1447_p2 = por %p1446_p1, %p1445_p0 }
  0x40   :  { %p1448_p3 = pnand %p1447_p2, %p1441_p13 }
  0x42   :  { %1451 = shalt.err (!%p1448_p3)
}
  0x43   :  { %59 = dma.hbm_to_vmem [thread:$0]  %s1620_s3, 1024, %s54_s7, [#allocation9], %s1483_s28, %s1483_s28, %s1484_s29  }
  0x44   :  { %1474 = dma.done.wait [#allocation3], 512  }
  0x45   :  { %1475 = vsyncadd [#allocation3], 4294966784 }
  0x46   :  { %1476 = dma.done.wait [#allocation6], 9216  }
  0x47   :  { %1477 = vsyncadd [#allocation6], 4294958080 }
  0x48   :  { %1478 = dma.done.wait [#allocation9], 1024  }
  0x49   :  { %1479 = vsyncadd [#allocation9], 4294966272  ;;  %v1276_v0 = vld [vmem:[#allocation5 + $0x40] sm:$0xff]   ;;  %v1280_v4 = vld [vmem:[#allocation5 + $0x48] sm:$0xff]   ;;  %vm1489_vm0 = vmmov 0   ;;  %s1490_s19 = smov [#allocation10]  }
  0x4a   :  { %v1277_v1 = vld [vmem:[#allocation5 + $0xc0] sm:$0xff]   ;;  %1121 = vmatprep.subr.bf16.mxu0 %v1276_v0  ;;  %v1281_v5 = vld [vmem:[#allocation5 + $0xc8] sm:$0xff]   ;;  %v1284_v8 = vld [vmem:[#allocation5 + $0x50] sm:$0xff]   ;;  %s1019_s20 = sshll.u32 %s1490_s19, 4  ;;  %s1020_s20 = int_to_ptr.vmem [resolvable:$true] %s1019_s20 }
  0x4b   :  { %v1278_v2 = vld [vmem:[#allocation5] sm:$0xff]   ;;  %1143 = vmatprep.subr.bf16.mxu1 %v1277_v1  ;;  %v1282_v6 = vld [vmem:[#allocation5 + $0x8] sm:$0xff]   ;;  %v1285_v9 = vld [vmem:[#allocation5 + $0xd0] sm:$0xff]   ;;  %s1452_s21 = scalar_lea.vmem %s1020_s20, 128  ;;  %p1457_p5 = scmp.lt.s32.totalorder %s1020_s20, %s1020_s20 }
  0x4c   :  { %v1279_v3 = vld [vmem:[#allocation5 + $0x80] sm:$0xff]   ;;  %1122 = vmatpush3.bf16.msra.mxu0 %v1278_v2  ;;  %v1283_v7 = vld [vmem:[#allocation5 + $0x88] sm:$0xff]   ;;  %v1286_v10 = vld [vmem:[#allocation5 + $0x10] sm:$0xff]   ;;  %p1453_p4 = scmp.ne.s32.totalorder %s1020_s20, %s1452_s21  ;;  %p1458_p6 = scmp.lt.s32.totalorder %s1452_s21, %s1452_s21 }
  0x4d   :  { %1144 = vmatpush3.bf16.msra.mxu1 %v1279_v3  ;;  %1123 = vmatprep.subr.bf16.mxu0 %v1280_v4  ;;  %v1287_v11 = vld [vmem:[#allocation5 + $0x90] sm:$0xff]   ;;  %v1288_v12 = vld [vmem:[#allocation5 + $0x58] sm:$0xff]   ;;  %v1292_v16 = vld [vmem:[#allocation5 + $0x60] sm:$0xff]  }
  0x4e   :  { %1145 = vmatprep.subr.bf16.mxu1 %v1281_v5  ;;  %v1289_v13 = vld [vmem:[#allocation5 + $0xd8] sm:$0xff]   ;;  %v1293_v17 = vld [vmem:[#allocation5 + $0xe0] sm:$0xff]   ;;  %v1296_v20 = vld [vmem:[#allocation5 + $0x68] sm:$0xff]   ;;  %p1459_p7 = por %p1458_p6, %p1457_p5 }
  0x4f   :  { %v1290_v14 = vld [vmem:[#allocation5 + $0x18] sm:$0xff]   ;;  %v1294_v18 = vld [vmem:[#allocation5 + $0x20] sm:$0xff]   ;;  %v1297_v21 = vld [vmem:[#allocation5 + $0xe8] sm:$0xff]  }
  0x50   :  { %1124 = vmatpush3.bf16.msra.mxu0 %v1282_v6  ;;  %v1291_v15 = vld [vmem:[#allocation5 + $0x98] sm:$0xff]   ;;  %v1295_v19 = vld [vmem:[#allocation5 + $0xa0] sm:$0xff]   ;;  %v1298_v22 = vld [vmem:[#allocation5 + $0x28] sm:$0xff]   ;;  %p1460_p8 = pnand %p1459_p7, %p1453_p4 }
  0x51   :  { %1146 = vmatpush3.bf16.msra.mxu1 %v1283_v7  ;;  %1125 = vmatprep.subr.bf16.mxu0 %v1284_v8  ;;  %v1299_v23 = vld [vmem:[#allocation5 + $0xa8] sm:$0xff]   ;;  %v1300_v24 = vld [vmem:[#allocation5 + $0x70] sm:$0xff]   ;;  %v1304_v28 = vld [vmem:[#allocation5 + $0x78] sm:$0xff]  }
  0x52   :  { %1147 = vmatprep.subr.bf16.mxu1 %v1285_v9  ;;  %v1301_v25 = vld [vmem:[#allocation5 + $0xf0] sm:$0xff]   ;;  %v1305_v29 = vld [vmem:[#allocation5 + $0xf8] sm:$0xff]   ;;  %v75_v32 = vld [vmem:[#allocation2] sm:$0xff] }
  0x53   :  { %v1302_v26 = vld [vmem:[#allocation5 + $0x30] sm:$0xff]   ;;  %v1306_v30 = vld [vmem:[#allocation5 + $0x38] sm:$0xff]   ;;  %v76_v33 = vld [vmem:[#allocation2 + $0x8] sm:$0xff]  ;;  %v1031_v34 = vcombine.low %v75_v32, %v75_v32  ;;  %v1032_v35 = vcombine.high %v75_v32, %v75_v32 }
  0x54   :  { %1126 = vmatpush3.bf16.msra.mxu0 %v1286_v10  ;;  %v1303_v27 = vld [vmem:[#allocation5 + $0xb0] sm:$0xff]   ;;  %v1307_v31 = vld [vmem:[#allocation5 + $0xb8] sm:$0xff]   ;;  %v1033_v36 = vcombine.low %v76_v33, %v76_v33  ;;  %v1034_v37 = vcombine.high %v76_v33, %v76_v33  ;;  %v1312_v38 = vld [vmem:[#allocation5 + $0x140] sm:$0xff]  }
  0x55   :  { %1148 = vmatpush3.bf16.msra.mxu1 %v1287_v11  ;;  %1127 = vmatprep.subr.bf16.mxu0 %v1288_v12  ;;  %v1313_v39 = vld [vmem:[#allocation5 + $0x1c0] sm:$0xff]   ;;  %v1316_v42 = vld [vmem:[#allocation5 + $0x148] sm:$0xff]   ;;  %v1320_v46 = vld [vmem:[#allocation5 + $0x150] sm:$0xff]  }
  0x56   :  { %1149 = vmatprep.subr.bf16.mxu1 %v1289_v13  ;;  %658 = vmatprep.mubr.bf16.mxu0 %v1032_v35  ;;  %v1314_v40 = vld [vmem:[#allocation5 + $0x100] sm:$0xff]   ;;  %v1317_v43 = vld [vmem:[#allocation5 + $0x1c8] sm:$0xff]   ;;  %v1321_v47 = vld [vmem:[#allocation5 + $0x1d0] sm:$0xff]   ;;  %v1488_v13 = vmov 0.0  }
  0x57   :  { %698 = vmatprep.mubr.bf16.mxu1 %v1034_v37  ;;  %v1315_v41 = vld [vmem:[#allocation5 + $0x180] sm:$0xff]   ;;  %v1318_v44 = vld [vmem:[#allocation5 + $0x108] sm:$0xff]   ;;  %v1322_v48 = vld [vmem:[#allocation5 + $0x110] sm:$0xff]  }
  0x58   :  { %1128 = vmatpush3.bf16.msra.mxu0 %v1290_v14  ;;  %v1319_v45 = vld [vmem:[#allocation5 + $0x188] sm:$0xff]   ;;  %v1323_v49 = vld [vmem:[#allocation5 + $0x190] sm:$0xff]   ;;  %v1324_v50 = vld [vmem:[#allocation5 + $0x158] sm:$0xff]  }
  0x59   :  { %1150 = vmatpush3.bf16.msra.mxu1 %v1291_v15  ;;  %1129 = vmatprep.subr.bf16.mxu0 %v1292_v16  ;;  %v1325_v51 = vld [vmem:[#allocation5 + $0x1d8] sm:$0xff]   ;;  %v1328_v54 = vld [vmem:[#allocation5 + $0x160] sm:$0xff]   ;;  %v1332_v58 = vld [vmem:[#allocation5 + $0x168] sm:$0xff]  }
  0x5a   :  { %1151 = vmatprep.subr.bf16.mxu1 %v1293_v17  ;;  %v1326_v52 = vld [vmem:[#allocation5 + $0x118] sm:$0xff]   ;;  %v1329_v55 = vld [vmem:[#allocation5 + $0x1e0] sm:$0xff]   ;;  %v1333_v59 = vld [vmem:[#allocation5 + $0x1e8] sm:$0xff]  }
  0x5b   :  { %v1327_v53 = vld [vmem:[#allocation5 + $0x198] sm:$0xff]   ;;  %v1330_v56 = vld [vmem:[#allocation5 + $0x120] sm:$0xff]   ;;  %v1334_v60 = vld [vmem:[#allocation5 + $0x128] sm:$0xff]  }
  0x5c   :  { %1130 = vmatpush3.bf16.msra.mxu0 %v1294_v18  ;;  %v1331_v57 = vld [vmem:[#allocation5 + $0x1a0] sm:$0xff]   ;;  %v1335_v61 = vld [vmem:[#allocation5 + $0x1a8] sm:$0xff]   ;;  %v1336_v62 = vld [vmem:[#allocation5 + $0x170] sm:$0xff]  }
  0x5d   :  { %1152 = vmatpush3.bf16.msra.mxu1 %v1295_v19  ;;  %1131 = vmatprep.subr.bf16.mxu0 %v1296_v20  ;;  %v1337_v63 = vld [vmem:[#allocation5 + $0x1f0] sm:$0xff]   ;;  %v1340_v2 = vld [vmem:[#allocation5 + $0x178] sm:$0xff]   ;;  %v1348_v12 = vld [vmem:[#allocation7] sm:$0xff]  }
  0x5e   :  { %1153 = vmatprep.subr.bf16.mxu1 %v1297_v21  ;;  %v1338_v0 = vld [vmem:[#allocation5 + $0x130] sm:$0xff]   ;;  %v1341_v3 = vld [vmem:[#allocation5 + $0x1f8] sm:$0xff]   ;;  %v1349_v14 = vld [vmem:[#allocation7 + $0x8] sm:$0xff]  }
  0x5f   :  { %v1339_v1 = vld [vmem:[#allocation5 + $0x1b0] sm:$0xff]   ;;  %v1342_v4 = vld [vmem:[#allocation5 + $0x138] sm:$0xff]   ;;  %v1352_v17 = vld [vmem:[#allocation7 + $0x20] sm:$0xff]  }
  0x60   :  { %1132 = vmatpush3.bf16.msra.mxu0 %v1298_v22  ;;  %v1343_v5 = vld [vmem:[#allocation5 + $0x1b8] sm:$0xff]   ;;  %v77_v6 = vld [vmem:[#allocation2 + $0x10] sm:$0xff]  ;;  %v1353_v18 = vld [vmem:[#allocation7 + $0x28] sm:$0xff]  }
  0x61   :  { %1154 = vmatpush3.bf16.msra.mxu1 %v1299_v23  ;;  %1133 = vmatprep.subr.bf16.mxu0 %v1300_v24  ;;  %v1035_v7 = vcombine.low %v77_v6, %v77_v6  ;;  %v1036_v8 = vcombine.high %v77_v6, %v77_v6  ;;  %v78_v9 = vld [vmem:[#allocation2 + $0x18] sm:$0xff]  ;;  %v1350_v15 = vld [vmem:[#allocation7 + $0x10] sm:$0xff]   ;;  %v1356_v21 = vld [vmem:[#allocation8] sm:$0xff]  }
  0x62   :  { %1155 = vmatprep.subr.bf16.mxu1 %v1301_v25  ;;  %v1037_v10 = vcombine.low %v78_v9, %v78_v9  ;;  %v1038_v11 = vcombine.high %v78_v9, %v78_v9  ;;  %v1351_v16 = vld [vmem:[#allocation7 + $0x18] sm:$0xff]   ;;  %v1354_v19 = vld [vmem:[#allocation7 + $0x30] sm:$0xff]   ;;  %v1357_v22 = vld [vmem:[#allocation8 + $0x8] sm:$0xff]  }
  0x63   :  { %v1355_v20 = vld [vmem:[#allocation7 + $0x38] sm:$0xff]   ;;  %v1358_v23 = vld [vmem:[#allocation8 + $0x10] sm:$0xff]   ;;  %v1360_v25 = vld [vmem:[#allocation8 + $0x20] sm:$0xff]  }
  0x64   :  { %1134 = vmatpush3.bf16.msra.mxu0 %v1302_v26  ;;  %v1359_v24 = vld [vmem:[#allocation8 + $0x18] sm:$0xff]   ;;  %v1361_v26 = vld [vmem:[#allocation8 + $0x28] sm:$0xff]  }
  0x65   :  { %1156 = vmatpush3.bf16.msra.mxu1 %v1303_v27  ;;  %1135 = vmatprep.subr.bf16.mxu0 %v1304_v28 }
  0x66   :  { %1157 = vmatprep.subr.bf16.mxu1 %v1305_v29  ;;  %v1030_v29 = vld [vmem:[%s1621_s4] ss:$0 sm:$0xff] }
  0x68   :  { %1136 = vmatpush3.bf16.msra.mxu0 %v1306_v30 }
  0x69   :  { %1158 = vmatpush3.bf16.msra.mxu1 %v1307_v31  ;;  %1165 = vmatprep.subr.bf16.mxu0 %v1312_v38 }
  0x6a   :  { %1187 = vmatprep.subr.bf16.mxu1 %v1313_v39 }
  0x6b   :  { %659 = vmatmul.mubr.bf16.vlgmr.msra.gmra.mrb[0].mxu0 %v1031_v34 }
  0x6c   :  { %699 = vmatmul.mubr.bf16.vlgmr.msra.gmra.mrb[0].mxu1 %v1033_v36  ;;  %1166 = vmatpush3.bf16.msra.mxu0 %v1314_v40 }
  0x6d   :  { %1188 = vmatpush3.bf16.msra.mxu1 %v1315_v41  ;;  %1167 = vmatprep.subr.bf16.mxu0 %v1316_v42 }
  0x6e   :  { %1189 = vmatprep.subr.bf16.mxu1 %v1317_v43  ;;  %738 = vmatprep.mubr.bf16.mxu0 %v1036_v8 }
  0x6f   :  { %778 = vmatprep.mubr.bf16.mxu1 %v1038_v11 }
  0x70   :  { %1168 = vmatpush3.bf16.msra.mxu0 %v1318_v44 }
  0x71   :  { %1190 = vmatpush3.bf16.msra.mxu1 %v1319_v45  ;;  %1169 = vmatprep.subr.bf16.mxu0 %v1320_v46 }
  0x72   :  { %1191 = vmatprep.subr.bf16.mxu1 %v1321_v47 }
  0x74   :  { %1170 = vmatpush3.bf16.msra.mxu0 %v1322_v48 }
  0x75   :  { %1192 = vmatpush3.bf16.msra.mxu1 %v1323_v49  ;;  %1171 = vmatprep.subr.bf16.mxu0 %v1324_v50 }
  0x76   :  { %1193 = vmatprep.subr.bf16.mxu1 %v1325_v51 }
  0x78   :  { %1172 = vmatpush3.bf16.msra.mxu0 %v1326_v52 }
  0x79   :  { %1194 = vmatpush3.bf16.msra.mxu1 %v1327_v53  ;;  %1173 = vmatprep.subr.bf16.mxu0 %v1328_v54  ;;  %v1362_v54 = vld [vmem:[#allocation8 + $0x30] sm:$0xff]  }
  0x7a   :  { %1195 = vmatprep.subr.bf16.mxu1 %v1329_v55  ;;  %v1363_v55 = vld [vmem:[#allocation8 + $0x38] sm:$0xff]  }
  0x7c   :  { %1174 = vmatpush3.bf16.msra.mxu0 %v1330_v56  ;;  %v1103_v56 = vld [vmem:[%s1621_s4 + $0x1] ss:$0 sm:$0xff] }
  0x7d   :  { %1196 = vmatpush3.bf16.msra.mxu1 %v1331_v57  ;;  %1175 = vmatprep.subr.bf16.mxu0 %v1332_v58 }
  0x7e   :  { %1197 = vmatprep.subr.bf16.mxu1 %v1333_v59 }
  0x80   :  { %1176 = vmatpush3.bf16.msra.mxu0 %v1334_v60 }
  0x81   :  { %1198 = vmatpush3.bf16.msra.mxu1 %v1335_v61  ;;  %1177 = vmatprep.subr.bf16.mxu0 %v1336_v62 }
  0x82   :  { %1199 = vmatprep.subr.bf16.mxu1 %v1337_v63 }
  0x84   :  { %1178 = vmatpush3.bf16.msra.mxu0 %v1338_v0  ;;  %v1112_v0 = vld [vmem:[%s1621_s4 + $0x2] ss:$0 sm:$0xff] }
  0x85   :  { %1200 = vmatpush3.bf16.msra.mxu1 %v1339_v1  ;;  %1179 = vmatprep.subr.bf16.mxu0 %v1340_v2 }
  0x86   :  { %1201 = vmatprep.subr.bf16.mxu1 %v1341_v3 }
  0x88   :  { %1180 = vmatpush3.bf16.msra.mxu0 %v1342_v4 }
  0x89   :  { %1202 = vmatpush3.bf16.msra.mxu1 %v1343_v5  ;;  %1227 = vmatprep.subr.bf16.mxu0 %v1488_v13 }
  0x8a   :  { %1247 = vmatprep.subr.bf16.mxu1 %v1488_v13 }
  0x8b   :  { %739 = vmatmul.mubr.bf16.vlgmr.msra.gmra.mrb[4].mxu0 %v1035_v7 }
  0x8c   :  { %779 = vmatmul.mubr.bf16.vlgmr.msra.gmra.mrb[4].mxu1 %v1037_v10  ;;  %1228 = vmatpush3.bf16.msra.mxu0 %v1348_v12 }
  0x8d   :  { %1229 = vmatprep.subr.bf16.mxu0 %v1488_v13  ;;  %1243 = vmatprep.mubr.msk.bf16.mxu0 %vm1489_vm0, %v1488_v13 }
  0x8e   :  { %1263 = vmatprep.mubr.msk.bf16.mxu1 %vm1489_vm0, %v1488_v13  ;;  %1248 = vmatpush3.bf16.msra.mxu1 %v1356_v21 }
  0x8f   :  { %1249 = vmatprep.subr.bf16.mxu1 %v1488_v13 }
  0x90   :  { %1230 = vmatpush3.bf16.msra.mxu0 %v1349_v14 }
  0x91   :  { %1231 = vmatprep.subr.bf16.mxu0 %v1488_v13 }
  0x92   :  { %1250 = vmatpush3.bf16.msra.mxu1 %v1357_v22 }
  0x93   :  { %1251 = vmatprep.subr.bf16.mxu1 %v1488_v13 }
  0x94   :  { %1232 = vmatpush3.bf16.msra.mxu0 %v1350_v15 }
  0x95   :  { %1233 = vmatprep.subr.bf16.mxu0 %v1488_v13 }
  0x96   :  { %1252 = vmatpush3.bf16.msra.mxu1 %v1358_v23 }
  0x97   :  { %1253 = vmatprep.subr.bf16.mxu1 %v1488_v13 }
  0x98   :  { %1234 = vmatpush3.bf16.msra.mxu0 %v1351_v16 }
  0x99   :  { %1235 = vmatprep.subr.bf16.mxu0 %v1488_v13 }
  0x9a   :  { %1254 = vmatpush3.bf16.msra.mxu1 %v1359_v24 }
  0x9b   :  { %1255 = vmatprep.subr.bf16.mxu1 %v1488_v13 }
  0x9c   :  { %1236 = vmatpush3.bf16.msra.mxu0 %v1352_v17 }
  0x9d   :  { %1237 = vmatprep.subr.bf16.mxu0 %v1488_v13 }
  0x9e   :  { %1256 = vmatpush3.bf16.msra.mxu1 %v1360_v25 }
  0x9f   :  { %1257 = vmatprep.subr.bf16.mxu1 %v1488_v13 }
  0xa0   :  { %1238 = vmatpush3.bf16.msra.mxu0 %v1353_v18 }
  0xa1   :  { %1239 = vmatprep.subr.bf16.mxu0 %v1488_v13 }
  0xa2   :  { %1258 = vmatpush3.bf16.msra.mxu1 %v1361_v26 }
  0xa3   :  { %1259 = vmatprep.subr.bf16.mxu1 %v1488_v13 }
  0xa4   :  { %1240 = vmatpush3.bf16.msra.mxu0 %v1354_v19 }
  0xa5   :  { %1241 = vmatprep.subr.bf16.mxu0 %v1488_v13 }
  0xa6   :  { %1260 = vmatpush3.bf16.msra.mxu1 %v1362_v54 }
  0xa7   :  { %1261 = vmatprep.subr.bf16.mxu1 %v1488_v13 }
  0xa8   :  { %1242 = vmatpush3.bf16.msra.mxu0 %v1355_v20 }
  0xaa   :  { %1262 = vmatpush3.bf16.msra.mxu1 %v1363_v55 }
 0x13e   :  { %v1137_v27 = vpop.f32.mrb[0].mxu0 }
 0x13f   :  { %v1159_v28 = vpop.f32.mrb[0].mxu1  ;;  %v1138_v30 = vpop.f32.mrb[1].mxu0 }
 0x140   :  { %v1160_v31 = vpop.f32.mrb[1].mxu1  ;;  %v1139_v32 = vadd.f32 %v1138_v30, %v1137_v27  ;;  %v1140_v34 = vpop.f32.mrb[2].mxu0 }
 0x141   :  { %v1161_v33 = vadd.f32 %v1160_v31, %v1159_v28  ;;  %v1162_v35 = vpop.f32.mrb[2].mxu1  ;;  %v1141_v36 = vpop.f32.mrb[3].mxu0 }
 0x142   :  { %v1163_v37 = vpop.f32.mrb[3].mxu1  ;;  %v661_v38 = vadd.f32 %v1139_v32, %v1030_v29 }
 0x144   :  { %v701_v39 = vadd.f32 %v1161_v33, %v661_v38 }
 0x15e   :  { %v1181_v40 = vpop.f32.mrb[4].mxu0 }
 0x15f   :  { %v1203_v41 = vpop.f32.mrb[4].mxu1  ;;  %v1182_v42 = vpop.f32.mrb[5].mxu0 }
 0x160   :  { %v1204_v43 = vpop.f32.mrb[5].mxu1  ;;  %v1183_v44 = vadd.f32 %v1182_v42, %v1181_v40  ;;  %v1184_v46 = vpop.f32.mrb[6].mxu0 }
 0x161   :  { %v1205_v45 = vadd.f32 %v1204_v43, %v1203_v41  ;;  %v1206_v47 = vpop.f32.mrb[6].mxu1  ;;  %v1185_v48 = vpop.f32.mrb[7].mxu0 }
 0x162   :  { %v1207_v49 = vpop.f32.mrb[7].mxu1  ;;  %v741_v50 = vadd.f32 %v1183_v44, %v701_v39 }
 0x164   :  { %v781_v51 = vadd.f32 %v1205_v45, %v741_v50 }
 0x166   :  { %v786_v52 = vmax.f32 %v781_v51, 0.0 }
 0x168   :  { %v787_v53 = vpack.c.bf16 %v786_v52, %v786_v52 }
 0x16a   :  { %1244 = vmatmul.mubr.bf16.vlgmr.msra.gmra.mrb[8].mxu0 %v787_v53 }
 0x23d   :  { %v893_v57 = vpop.f32.mrb[8].mxu0 }
 0x23e   :  { %v894_v58 = vadd.f32 %v1103_v56, %v893_v57  ;;  %v1245_v59 = vpop.f32.mrb[9].mxu0 }
 0x23f   :  { %v896_v60 = vpop.f32.mrb[10].mxu0 }
 0x240   :  { %v899_v61 = vmax.f32 %v894_v58, 0.0  ;;  %v1246_v62 = vpop.f32.mrb[11].mxu0 }
 0x242   :  { %v900_v63 = vpack.c.bf16 %v899_v61, %v899_v61 }
 0x244   :  { %1264 = vmatmul.mubr.bf16.vlgmr.msra.gmra.mrb[8].mxu1 %v900_v63 }
 0x317   :  { %v1006_v1 = vpop.f32.mrb[8].mxu1 }
 0x318   :  { %v1007_v2 = vadd.f32 %v1112_v0, %v1006_v1  ;;  %v1265_v3 = vpop.f32.mrb[9].mxu1 }
 0x319   :  { %v1009_v4 = vpop.f32.mrb[10].mxu1 }
 0x31a   :  { %1012 = vst [vmem:[#allocation10] sm:$0xff] %v1007_v2  ;;  %v1266_v5 = vpop.f32.mrb[11].mxu1 }
 0x31b   :  { %1463 = shalt.err (!%p1460_p8)
}
 0x31c   :  { %s1464_s4 = scalar_lea.hbm %s1622_s5, 128 }
 0x31d   :  { %p1465_p9 = scmp.ne.s32.totalorder %s1622_s5, %s1464_s4  ;;  %p1468_p10 = scmp.lt.u32.totalorder %s1464_s4, %s1622_s5 }
 0x31f   :  { %p1470_p11 = pnand %p1468_p10, %p1465_p9 }
 0x321   :  { %1473 = shalt.err (!%p1470_p11)
}
 0x322   :  { %1022 = dma.vmem_to_hbm [thread:$0]  %s1020_s20, 128, %s1622_s5, [#allocation4]  }
 0x323   :  { %1480 = dma.done.wait [#allocation4], 128  }
 0x324   :  { %1481 = vsyncadd [#allocation4], 4294967168 }
 0x325   :  { %1026 = vsyncpa [#allocation3], 1 }
 0x326   :  { %1027 = vsyncpa [#allocation6], 1 }
 0x327   :  { %1028 = vsyncpa [#allocation9], 1 }
 0x328   :  { %1029 = vsyncpa [#allocation4], 1 }

// kernel: tpu_custom_call.1
= control target key start
LH: loop header
LB: loop body
LE: loop exit
PB: predicated region body
PF: predicated region fallthrough
CT: control target
= control target key end

     0   :  { %10 = vsyncpa [#allocation3], 0  ;;  %s1617_s0 = inlined_call_operand.hbm [shape: bf16[8,1024], index: 0, kind: input, shape index: {}]   ;;  %s1618_s1 = inlined_call_operand.hbm [shape: bf16[1024,128], index: 1, kind: input, shape index: {}]   ;;  %s1619_s2 = inlined_call_operand.hbm [shape: bf16[128,128], index: 2, kind: input, shape index: {}]   ;;  %s1620_s3 = inlined_call_operand.hbm [shape: bf16[128,128], index: 3, kind: input, shape index: {}]   ;;  %s1621_s4 = inlined_call_operand.vmem [shape: f32[1,384], index: 4, kind: input, shape index: {}]   ;;  %s1622_s5 = inlined_call_operand.hbm [shape: f32[8,128], index: 5, kind: output, shape index: {}]  }
   0x1   :  { %11 = vsyncpa [#allocation6], 0 }
   0x2   :  { %12 = vsyncpa [#allocation9], 0 }
   0x3   :  { %13 = vsyncpa [#allocation4], 0  ;;  %s1482_s18 = smov [#allocation5]   ;;  %s1364_s22 = scalar_lea.hbm %s1618_s1, 8192 }
   0x4   :  { %s29_s19 = sshll.u32 %s1482_s18, 4  ;;  %p1365_p0 = scmp.ne.s32.totalorder %s1618_s1, %s1364_s22  ;;  %s30_s19 = int_to_ptr.vmem [resolvable:$true] %s29_s19 }
   0x5   :  { %p1368_p1 = scmp.lt.u32.totalorder %s1364_s22, %s1618_s1 }
   0x7   :  { %p1370_p2 = pnand %p1368_p1, %p1365_p0 }
   0x9   :  { %1373 = shalt.err (!%p1370_p2)
}
   0xa   :  { %s1374_s27 = scalar_lea.vmem %s30_s19, 8192  ;;  %p1379_p4 = scmp.lt.s32.totalorder %s30_s19, %s30_s19 }
   0xb   :  { %p1375_p3 = scmp.ne.s32.totalorder %s30_s19, %s1374_s27  ;;  %p1380_p5 = scmp.lt.s32.totalorder %s1374_s27, %s1374_s27 }
   0xd   :  { %p1381_p6 = por %p1380_p5, %p1379_p4 }
   0xf   :  { %p1382_p7 = pnand %p1381_p6, %p1375_p3 }
  0x11   :  { %1385 = shalt.err (!%p1382_p7)
}
  0x12   :  { %s1483_s28 = smov 64   ;;  %s1484_s29 = smov 4  }
  0x13   :  { %35 = dma.hbm_to_vmem [thread:$0]  %s1618_s1, 8192, %s30_s19, [#allocation6], %s1483_s28, %s1483_s28, %s1484_s29  }
  0x14   :  { %s1485_s7 = smov [#allocation2]   ;;  %s1486_s9 = smov [#allocation7]  }
  0x15   :  { %s20_s8 = sshll.u32 %s1485_s7, 4  ;;  %s41_s10 = sshll.u32 %s1486_s9, 4  ;;  %s21_s8 = int_to_ptr.vmem [resolvable:$true] %s20_s8  ;;  %s42_s10 = int_to_ptr.vmem [resolvable:$true] %s41_s10 }
  0x16   :  { %s1386_s13 = scalar_lea.hbm %s1617_s0, 512 }
  0x17   :  { %p1387_p8 = scmp.ne.s32.totalorder %s1617_s0, %s1386_s13  ;;  %p1390_p9 = scmp.lt.u32.totalorder %s1386_s13, %s1617_s0 }
  0x19   :  { %p1392_p10 = pnand %p1390_p9, %p1387_p8 }
  0x1b   :  { %1395 = shalt.err (!%p1392_p10)
}
  0x1c   :  { %s1396_s1 = scalar_lea.vmem %s21_s8, 512  ;;  %p1401_p12 = scmp.lt.s32.totalorder %s21_s8, %s21_s8 }
  0x1d   :  { %p1397_p11 = scmp.ne.s32.totalorder %s21_s8, %s1396_s1  ;;  %p1402_p13 = scmp.lt.s32.totalorder %s1396_s1, %s1396_s1 }
  0x1f   :  { %p1403_p0 = por %p1402_p13, %p1401_p12 }
  0x21   :  { %p1404_p1 = pnand %p1403_p0, %p1397_p11 }
  0x23   :  { %1407 = shalt.err (!%p1404_p1)
}
  0x24   :  { %23 = dma.hbm_to_vmem [thread:$0]  %s1617_s0, 512, %s21_s8, [#allocation3]  }
  0x25   :  { %s1408_s22 = scalar_lea.hbm %s1619_s2, 1024 }
  0x26   :  { %p1409_p2 = scmp.ne.s32.totalorder %s1619_s2, %s1408_s22  ;;  %p1412_p3 = scmp.lt.u32.totalorder %s1408_s22, %s1619_s2 }
  0x28   :  { %p1414_p4 = pnand %p1412_p3, %p1409_p2 }
  0x2a   :  { %1417 = shalt.err (!%p1414_p4)
}
  0x2b   :  { %s1418_s27 = scalar_lea.vmem %s42_s10, 1024  ;;  %p1423_p6 = scmp.lt.s32.totalorder %s42_s10, %s42_s10 }
  0x2c   :  { %p1419_p5 = scmp.ne.s32.totalorder %s42_s10, %s1418_s27  ;;  %p1424_p7 = scmp.lt.s32.totalorder %s1418_s27, %s1418_s27 }
  0x2e   :  { %p1425_p8 = por %p1424_p7, %p1423_p6 }
  0x30   :  { %p1426_p9 = pnand %p1425_p8, %p1419_p5 }
  0x32   :  { %1429 = shalt.err (!%p1426_p9)
}
  0x33   :  { %47 = dma.hbm_to_vmem [thread:$0]  %s1619_s2, 1024, %s42_s10, [#allocation6], %s1483_s28, %s1483_s28, %s1484_s29  }
  0x34   :  { %s1487_s6 = smov [#allocation8]   ;;  %s1430_s11 = scalar_lea.hbm %s1620_s3, 1024 }
  0x35   :  { %s53_s7 = sshll.u32 %s1487_s6, 4  ;;  %p1431_p10 = scmp.ne.s32.totalorder %s1620_s3, %s1430_s11  ;;  %s54_s7 = int_to_ptr.vmem [resolvable:$true] %s53_s7 }
  0x36   :  { %p1434_p11 = scmp.lt.u32.totalorder %s1430_s11, %s1620_s3 }
  0x38   :  { %p1436_p12 = pnand %p1434_p11, %p1431_p10 }
  0x3a   :  { %1439 = shalt.err (!%p1436_p12)
}
  0x3b   :  { %s1440_s16 = scalar_lea.vmem %s54_s7, 1024  ;;  %p1445_p0 = scmp.lt.s32.totalorder %s54_s7, %s54_s7 }
  0x3c   :  { %p1441_p13 = scmp.ne.s32.totalorder %s54_s7, %s1440_s16  ;;  %p1446_p1 = scmp.lt.s32.totalorder %s1440_s16, %s1440_s16 }
  0x3e   :  { %p1447_p2 = por %p1446_p1, %p1445_p0 }
  0x40   :  { %p1448_p3 = pnand %p1447_p2, %p1441_p13 }
  0x42   :  { %1451 = shalt.err (!%p1448_p3)
}
  0x43   :  { %59 = dma.hbm_to_vmem [thread:$0]  %s1620_s3, 1024, %s54_s7, [#allocation9], %s1483_s28, %s1483_s28, %s1484_s29  }
  0x44   :  { %1474 = dma.done.wait [#allocation3], 512  }
  0x45   :  { %1475 = vsyncadd [#allocation3], 4294966784 }
  0x46   :  { %1476 = dma.done.wait [#allocation6], 9216  }
  0x47   :  { %1477 = vsyncadd [#allocation6], 4294958080 }
  0x48   :  { %1478 = dma.done.wait [#allocation9], 1024  }
  0x49   :  { %1479 = vsyncadd [#allocation9], 4294966272  ;;  %v1276_v0 = vld [vmem:[#allocation5 + $0x40] sm:$0xff]   ;;  %v1280_v4 = vld [vmem:[#allocation5 + $0x48] sm:$0xff]   ;;  %vm1489_vm0 = vmmov 0   ;;  %s1490_s19 = smov [#allocation10]  }
  0x4a   :  { %v1277_v1 = vld [vmem:[#allocation5 + $0xc0] sm:$0xff]   ;;  %1121 = vmatprep.subr.bf16.mxu0 %v1276_v0  ;;  %v1281_v5 = vld [vmem:[#allocation5 + $0xc8] sm:$0xff]   ;;  %v1284_v8 = vld [vmem:[#allocation5 + $0x50] sm:$0xff]   ;;  %s1019_s20 = sshll.u32 %s1490_s19, 4  ;;  %s1020_s20 = int_to_ptr.vmem [resolvable:$true] %s1019_s20 }
  0x4b   :  { %v1278_v2 = vld [vmem:[#allocation5] sm:$0xff]   ;;  %1143 = vmatprep.subr.bf16.mxu1 %v1277_v1  ;;  %v1282_v6 = vld [vmem:[#allocation5 + $0x8] sm:$0xff]   ;;  %v1285_v9 = vld [vmem:[#allocation5 + $0xd0] sm:$0xff]   ;;  %s1452_s21 = scalar_lea.vmem %s1020_s20, 128  ;;  %p1457_p5 = scmp.lt.s32.totalorder %s1020_s20, %s1020_s20 }
  0x4c   :  { %v1279_v3 = vld [vmem:[#allocation5 + $0x80] sm:$0xff]   ;;  %1122 = vmatpush3.bf16.msra.mxu0 %v1278_v2  ;;  %v1283_v7 = vld [vmem:[#allocation5 + $0x88] sm:$0xff]   ;;  %v1286_v10 = vld [vmem:[#allocation5 + $0x10] sm:$0xff]   ;;  %p1453_p4 = scmp.ne.s32.totalorder %s1020_s20, %s1452_s21  ;;  %p1458_p6 = scmp.lt.s32.totalorder %s1452_s21, %s1452_s21 }
  0x4d   :  { %1144 = vmatpush3.bf16.msra.mxu1 %v1279_v3  ;;  %1123 = vmatprep.subr.bf16.mxu0 %v1280_v4  ;;  %v1287_v11 = vld [vmem:[#allocation5 + $0x90] sm:$0xff]   ;;  %v1288_v12 = vld [vmem:[#allocation5 + $0x58] sm:$0xff]   ;;  %v1292_v16 = vld [vmem:[#allocation5 + $0x60] sm:$0xff]  }
  0x4e   :  { %1145 = vmatprep.subr.bf16.mxu1 %v1281_v5  ;;  %v1289_v13 = vld [vmem:[#allocation5 + $0xd8] sm:$0xff]   ;;  %v1293_v17 = vld [vmem:[#allocation5 + $0xe0] sm:$0xff]   ;;  %v1296_v20 = vld [vmem:[#allocation5 + $0x68] sm:$0xff]   ;;  %p1459_p7 = por %p1458_p6, %p1457_p5 }
  0x4f   :  { %v1290_v14 = vld [vmem:[#allocation5 + $0x18] sm:$0xff]   ;;  %v1294_v18 = vld [vmem:[#allocation5 + $0x20] sm:$0xff]   ;;  %v1297_v21 = vld [vmem:[#allocation5 + $0xe8] sm:$0xff]  }
  0x50   :  { %1124 = vmatpush3.bf16.msra.mxu0 %v1282_v6  ;;  %v1291_v15 = vld [vmem:[#allocation5 + $0x98] sm:$0xff]   ;;  %v1295_v19 = vld [vmem:[#allocation5 + $0xa0] sm:$0xff]   ;;  %v1298_v22 = vld [vmem:[#allocation5 + $0x28] sm:$0xff]   ;;  %p1460_p8 = pnand %p1459_p7, %p1453_p4 }
  0x51   :  { %1146 = vmatpush3.bf16.msra.mxu1 %v1283_v7  ;;  %1125 = vmatprep.subr.bf16.mxu0 %v1284_v8  ;;  %v1299_v23 = vld [vmem:[#allocation5 + $0xa8] sm:$0xff]   ;;  %v1300_v24 = vld [vmem:[#allocation5 + $0x70] sm:$0xff]   ;;  %v1304_v28 = vld [vmem:[#allocation5 + $0x78] sm:$0xff]  }
  0x52   :  { %1147 = vmatprep.subr.bf16.mxu1 %v1285_v9  ;;  %v1301_v25 = vld [vmem:[#allocation5 + $0xf0] sm:$0xff]   ;;  %v1305_v29 = vld [vmem:[#allocation5 + $0xf8] sm:$0xff]   ;;  %v75_v32 = vld [vmem:[#allocation2] sm:$0xff] }
  0x53   :  { %v1302_v26 = vld [vmem:[#allocation5 + $0x30] sm:$0xff]   ;;  %v1306_v30 = vld [vmem:[#allocation5 + $0x38] sm:$0xff]   ;;  %v76_v33 = vld [vmem:[#allocation2 + $0x8] sm:$0xff]  ;;  %v1031_v34 = vcombine.low %v75_v32, %v75_v32  ;;  %v1032_v35 = vcombine.high %v75_v32, %v75_v32 }
  0x54   :  { %1126 = vmatpush3.bf16.msra.mxu0 %v1286_v10  ;;  %v1303_v27 = vld [vmem:[#allocation5 + $0xb0] sm:$0xff]   ;;  %v1307_v31 = vld [vmem:[#allocation5 + $0xb8] sm:$0xff]   ;;  %v1033_v36 = vcombine.low %v76_v33, %v76_v33  ;;  %v1034_v37 = vcombine.high %v76_v33, %v76_v33  ;;  %v1312_v38 = vld [vmem:[#allocation5 + $0x140] sm:$0xff]  }
  0x55   :  { %1148 = vmatpush3.bf16.msra.mxu1 %v1287_v11  ;;  %1127 = vmatprep.subr.bf16.mxu0 %v1288_v12  ;;  %v1313_v39 = vld [vmem:[#allocation5 + $0x1c0] sm:$0xff]   ;;  %v1316_v42 = vld [vmem:[#allocation5 + $0x148] sm:$0xff]   ;;  %v1320_v46 = vld [vmem:[#allocation5 + $0x150] sm:$0xff]  }
  0x56   :  { %1149 = vmatprep.subr.bf16.mxu1 %v1289_v13  ;;  %658 = vmatprep.mubr.bf16.mxu0 %v1032_v35  ;;  %v1314_v40 = vld [vmem:[#allocation5 + $0x100] sm:$0xff]   ;;  %v1317_v43 = vld [vmem:[#allocation5 + $0x1c8] sm:$0xff]   ;;  %v1321_v47 = vld [vmem:[#allocation5 + $0x1d0] sm:$0xff]   ;;  %v1488_v13 = vmov 0.0  }
  0x57   :  { %698 = vmatprep.mubr.bf16.mxu1 %v1034_v37  ;;  %v1315_v41 = vld [vmem:[#allocation5 + $0x180] sm:$0xff]   ;;  %v1318_v44 = vld [vmem:[#allocation5 + $0x108] sm:$0xff]   ;;  %v1322_v48 = vld [vmem:[#allocation5 + $0x110] sm:$0xff]  }
  0x58   :  { %1128 = vmatpush3.bf16.msra.mxu0 %v1290_v14  ;;  %v1319_v45 = vld [vmem:[#allocation5 + $0x188] sm:$0xff]   ;;  %v1323_v49 = vld [vmem:[#allocation5 + $0x190] sm:$0xff]   ;;  %v1324_v50 = vld [vmem:[#allocation5 + $0x158] sm:$0xff]  }
  0x59   :  { %1150 = vmatpush3.bf16.msra.mxu1 %v1291_v15  ;;  %1129 = vmatprep.subr.bf16.mxu0 %v1292_v16  ;;  %v1325_v51 = vld [vmem:[#allocation5 + $0x1d8] sm:$0xff]   ;;  %v1328_v54 = vld [vmem:[#allocation5 + $0x160] sm:$0xff]   ;;  %v1332_v58 = vld [vmem:[#allocation5 + $0x168] sm:$0xff]  }
  0x5a   :  { %1151 = vmatprep.subr.bf16.mxu1 %v1293_v17  ;;  %v1326_v52 = vld [vmem:[#allocation5 + $0x118] sm:$0xff]   ;;  %v1329_v55 = vld [vmem:[#allocation5 + $0x1e0] sm:$0xff]   ;;  %v1333_v59 = vld [vmem:[#allocation5 + $0x1e8] sm:$0xff]  }
  0x5b   :  { %v1327_v53 = vld [vmem:[#allocation5 + $0x198] sm:$0xff]   ;;  %v1330_v56 = vld [vmem:[#allocation5 + $0x120] sm:$0xff]   ;;  %v1334_v60 = vld [vmem:[#allocation5 + $0x128] sm:$0xff]  }
  0x5c   :  { %1130 = vmatpush3.bf16.msra.mxu0 %v1294_v18  ;;  %v1331_v57 = vld [vmem:[#allocation5 + $0x1a0] sm:$0xff]   ;;  %v1335_v61 = vld [vmem:[#allocation5 + $0x1a8] sm:$0xff]   ;;  %v1336_v62 = vld [vmem:[#allocation5 + $0x170] sm:$0xff]  }
  0x5d   :  { %1152 = vmatpush3.bf16.msra.mxu1 %v1295_v19  ;;  %1131 = vmatprep.subr.bf16.mxu0 %v1296_v20  ;;  %v1337_v63 = vld [vmem:[#allocation5 + $0x1f0] sm:$0xff]   ;;  %v1340_v2 = vld [vmem:[#allocation5 + $0x178] sm:$0xff]   ;;  %v1348_v12 = vld [vmem:[#allocation7] sm:$0xff]  }
  0x5e   :  { %1153 = vmatprep.subr.bf16.mxu1 %v1297_v21  ;;  %v1338_v0 = vld [vmem:[#allocation5 + $0x130] sm:$0xff]   ;;  %v1341_v3 = vld [vmem:[#allocation5 + $0x1f8] sm:$0xff]   ;;  %v1349_v14 = vld [vmem:[#allocation7 + $0x8] sm:$0xff]  }
  0x5f   :  { %v1339_v1 = vld [vmem:[#allocation5 + $0x1b0] sm:$0xff]   ;;  %v1342_v4 = vld [vmem:[#allocation5 + $0x138] sm:$0xff]   ;;  %v1352_v17 = vld [vmem:[#allocation7 + $0x20] sm:$0xff]  }
  0x60   :  { %1132 = vmatpush3.bf16.msra.mxu0 %v1298_v22  ;;  %v1343_v5 = vld [vmem:[#allocation5 + $0x1b8] sm:$0xff]   ;;  %v77_v6 = vld [vmem:[#allocation2 + $0x10] sm:$0xff]  ;;  %v1353_v18 = vld [vmem:[#allocation7 + $0x28] sm:$0xff]  }
  0x61   :  { %1154 = vmatpush3.bf16.msra.mxu1 %v1299_v23  ;;  %1133 = vmatprep.subr.bf16.mxu0 %v1300_v24  ;;  %v1035_v7 = vcombine.low %v77_v6, %v77_v6  ;;  %v1036_v8 = vcombine.high %v77_v6, %v77_v6  ;;  %v78_v9 = vld [vmem:[#allocation2 + $0x18] sm:$0xff]  ;;  %v1350_v15 = vld [vmem:[#allocation7 + $0x10] sm:$0xff]   ;;  %v1356_v21 = vld [vmem:[#allocation8] sm:$0xff]  }
  0x62   :  { %1155 = vmatprep.subr.bf16.mxu1 %v1301_v25  ;;  %v1037_v10 = vcombine.low %v78_v9, %v78_v9  ;;  %v1038_v11 = vcombine.high %v78_v9, %v78_v9  ;;  %v1351_v16 = vld [vmem:[#allocation7 + $0x18] sm:$0xff]   ;;  %v1354_v19 = vld [vmem:[#allocation7 + $0x30] sm:$0xff]   ;;  %v1357_v22 = vld [vmem:[#allocation8 + $0x8] sm:$0xff]  }
  0x63   :  { %v1355_v20 = vld [vmem:[#allocation7 + $0x38] sm:$0xff]   ;;  %v1358_v23 = vld [vmem:[#allocation8 + $0x10] sm:$0xff]   ;;  %v1360_v25 = vld [vmem:[#allocation8 + $0x20] sm:$0xff]  }
  0x64   :  { %1134 = vmatpush3.bf16.msra.mxu0 %v1302_v26  ;;  %v1359_v24 = vld [vmem:[#allocation8 + $0x18] sm:$0xff]   ;;  %v1361_v26 = vld [vmem:[#allocation8 + $0x28] sm:$0xff]  }
  0x65   :  { %1156 = vmatpush3.bf16.msra.mxu1 %v1303_v27  ;;  %1135 = vmatprep.subr.bf16.mxu0 %v1304_v28 }
  0x66   :  { %1157 = vmatprep.subr.bf16.mxu1 %v1305_v29  ;;  %v1030_v29 = vld [vmem:[%s1621_s4] ss:$0 sm:$0xff] }
  0x68   :  { %1136 = vmatpush3.bf16.msra.mxu0 %v1306_v30 }
  0x69   :  { %1158 = vmatpush3.bf16.msra.mxu1 %v1307_v31  ;;  %1165 = vmatprep.subr.bf16.mxu0 %v1312_v38 }
  0x6a   :  { %1187 = vmatprep.subr.bf16.mxu1 %v1313_v39 }
  0x6b   :  { %659 = vmatmul.mubr.bf16.vlgmr.msra.gmra.mrb[0].mxu0 %v1031_v34 }
  0x6c   :  { %699 = vmatmul.mubr.bf16.vlgmr.msra.gmra.mrb[0].mxu1 %v1033_v36  ;;  %1166 = vmatpush3.bf16.msra.mxu0 %v1314_v40 }
  0x6d   :  { %1188 = vmatpush3.bf16.msra.mxu1 %v1315_v41  ;;  %1167 = vmatprep.subr.bf16.mxu0 %v1316_v42 }
  0x6e   :  { %1189 = vmatprep.subr.bf16.mxu1 %v1317_v43  ;;  %738 = vmatprep.mubr.bf16.mxu0 %v1036_v8 }
  0x6f   :  { %778 = vmatprep.mubr.bf16.mxu1 %v1038_v11 }
  0x70   :  { %1168 = vmatpush3.bf16.msra.mxu0 %v1318_v44 }
  0x71   :  { %1190 = vmatpush3.bf16.msra.mxu1 %v1319_v45  ;;  %1169 = vmatprep.subr.bf16.mxu0 %v1320_v46 }
  0x72   :  { %1191 = vmatprep.subr.bf16.mxu1 %v1321_v47 }
  0x74   :  { %1170 = vmatpush3.bf16.msra.mxu0 %v1322_v48 }
  0x75   :  { %1192 = vmatpush3.bf16.msra.mxu1 %v1323_v49  ;;  %1171 = vmatprep.subr.bf16.mxu0 %v1324_v50 }
  0x76   :  { %1193 = vmatprep.subr.bf16.mxu1 %v1325_v51 }
  0x78   :  { %1172 = vmatpush3.bf16.msra.mxu0 %v1326_v52 }
  0x79   :  { %1194 = vmatpush3.bf16.msra.mxu1 %v1327_v53  ;;  %1173 = vmatprep.subr.bf16.mxu0 %v1328_v54  ;;  %v1362_v54 = vld [vmem:[#allocation8 + $0x30] sm:$0xff]  }
  0x7a   :  { %1195 = vmatprep.subr.bf16.mxu1 %v1329_v55  ;;  %v1363_v55 = vld [vmem:[#allocation8 + $0x38] sm:$0xff]  }
  0x7c   :  { %1174 = vmatpush3.bf16.msra.mxu0 %v1330_v56  ;;  %v1103_v56 = vld [vmem:[%s1621_s4 + $0x1] ss:$0 sm:$0xff] }
  0x7d   :  { %1196 = vmatpush3.bf16.msra.mxu1 %v1331_v57  ;;  %1175 = vmatprep.subr.bf16.mxu0 %v1332_v58 }
  0x7e   :  { %1197 = vmatprep.subr.bf16.mxu1 %v1333_v59 }
  0x80   :  { %1176 = vmatpush3.bf16.msra.mxu0 %v1334_v60 }
  0x81   :  { %1198 = vmatpush3.bf16.msra.mxu1 %v1335_v61  ;;  %1177 = vmatprep.subr.bf16.mxu0 %v1336_v62 }
  0x82   :  { %1199 = vmatprep.subr.bf16.mxu1 %v1337_v63 }
  0x84   :  { %1178 = vmatpush3.bf16.msra.mxu0 %v1338_v0  ;;  %v1112_v0 = vld [vmem:[%s1621_s4 + $0x2] ss:$0 sm:$0xff] }
  0x85   :  { %1200 = vmatpush3.bf16.msra.mxu1 %v1339_v1  ;;  %1179 = vmatprep.subr.bf16.mxu0 %v1340_v2 }
  0x86   :  { %1201 = vmatprep.subr.bf16.mxu1 %v1341_v3 }
  0x88   :  { %1180 = vmatpush3.bf16.msra.mxu0 %v1342_v4 }
  0x89   :  { %1202 = vmatpush3.bf16.msra.mxu1 %v1343_v5  ;;  %1227 = vmatprep.subr.bf16.mxu0 %v1488_v13 }
  0x8a   :  { %1247 = vmatprep.subr.bf16.mxu1 %v1488_v13 }
  0x8b   :  { %739 = vmatmul.mubr.bf16.vlgmr.msra.gmra.mrb[4].mxu0 %v1035_v7 }
  0x8c   :  { %779 = vmatmul.mubr.bf16.vlgmr.msra.gmra.mrb[4].mxu1 %v1037_v10  ;;  %1228 = vmatpush3.bf16.msra.mxu0 %v1348_v12 }
  0x8d   :  { %1229 = vmatprep.subr.bf16.mxu0 %v1488_v13  ;;  %1243 = vmatprep.mubr.msk.bf16.mxu0 %vm1489_vm0, %v1488_v13 }
  0x8e   :  { %1263 = vmatprep.mubr.msk.bf16.mxu1 %vm1489_vm0, %v1488_v13  ;;  %1248 = vmatpush3.bf16.msra.mxu1 %v1356_v21 }
  0x8f   :  { %1249 = vmatprep.subr.bf16.mxu1 %v1488_v13 }
  0x90   :  { %1230 = vmatpush3.bf16.msra.mxu0 %v1349_v14 }
  0x91   :  { %1231 = vmatprep.subr.bf16.mxu0 %v1488_v13 }
  0x92   :  { %1250 = vmatpush3.bf16.msra.mxu1 %v1357_v22 }
  0x93   :  { %1251 = vmatprep.subr.bf16.mxu1 %v1488_v13 }
  0x94   :  { %1232 = vmatpush3.bf16.msra.mxu0 %v1350_v15 }
  0x95   :  { %1233 = vmatprep.subr.bf16.mxu0 %v1488_v13 }
  0x96   :  { %1252 = vmatpush3.bf16.msra.mxu1 %v1358_v23 }
  0x97   :  { %1253 = vmatprep.subr.bf16.mxu1 %v1488_v13 }
  0x98   :  { %1234 = vmatpush3.bf16.msra.mxu0 %v1351_v16 }
  0x99   :  { %1235 = vmatprep.subr.bf16.mxu0 %v1488_v13 }
  0x9a   :  { %1254 = vmatpush3.bf16.msra.mxu1 %v1359_v24 }
  0x9b   :  { %1255 = vmatprep.subr.bf16.mxu1 %v1488_v13 }
  0x9c   :  { %1236 = vmatpush3.bf16.msra.mxu0 %v1352_v17 }
  0x9d   :  { %1237 = vmatprep.subr.bf16.mxu0 %v1488_v13 }
  0x9e   :  { %1256 = vmatpush3.bf16.msra.mxu1 %v1360_v25 }
  0x9f   :  { %1257 = vmatprep.subr.bf16.mxu1 %v1488_v13 }
  0xa0   :  { %1238 = vmatpush3.bf16.msra.mxu0 %v1353_v18 }
  0xa1   :  { %1239 = vmatprep.subr.bf16.mxu0 %v1488_v13 }
  0xa2   :  { %1258 = vmatpush3.bf16.msra.mxu1 %v1361_v26 }
  0xa3   :  { %1259 = vmatprep.subr.bf16.mxu1 %v1488_v13 }
  0xa4   :  { %1240 = vmatpush3.bf16.msra.mxu0 %v1354_v19 }
  0xa5   :  { %1241 = vmatprep.subr.bf16.mxu0 %v1488_v13 }
  0xa6   :  { %1260 = vmatpush3.bf16.msra.mxu1 %v1362_v54 }
  0xa7   :  { %1261 = vmatprep.subr.bf16.mxu1 %v1488_v13 }
  0xa8   :  { %1242 = vmatpush3.bf16.msra.mxu0 %v1355_v20 }
  0xaa   :  { %1262 = vmatpush3.bf16.msra.mxu1 %v1363_v55 }
 0x13e   :  { %v1137_v27 = vpop.f32.mrb[0].mxu0 }
 0x13f   :  { %v1159_v28 = vpop.f32.mrb[0].mxu1  ;;  %v1138_v30 = vpop.f32.mrb[1].mxu0 }
 0x140   :  { %v1160_v31 = vpop.f32.mrb[1].mxu1  ;;  %v1139_v32 = vadd.f32 %v1138_v30, %v1137_v27  ;;  %v1140_v34 = vpop.f32.mrb[2].mxu0 }
 0x141   :  { %v1161_v33 = vadd.f32 %v1160_v31, %v1159_v28  ;;  %v1162_v35 = vpop.f32.mrb[2].mxu1  ;;  %v1141_v36 = vpop.f32.mrb[3].mxu0 }
 0x142   :  { %v1163_v37 = vpop.f32.mrb[3].mxu1  ;;  %v661_v38 = vadd.f32 %v1139_v32, %v1030_v29 }
 0x144   :  { %v701_v39 = vadd.f32 %v1161_v33, %v661_v38 }
 0x15e   :  { %v1181_v40 = vpop.f32.mrb[4].mxu0 }
 0x15f   :  { %v1203_v41 = vpop.f32.mrb[4].mxu1  ;;  %v1182_v42 = vpop.f32.mrb[5].mxu0 }
 0x160   :  { %v1204_v43 = vpop.f32.mrb[5].mxu1  ;;  %v1183_v44 = vadd.f32 %v1182_v42, %v1181_v40  ;;  %v1184_v46 = vpop.f32.mrb[6].mxu0 }
 0x161   :  { %v1205_v45 = vadd.f32 %v1204_v43, %v1203_v41  ;;  %v1206_v47 = vpop.f32.mrb[6].mxu1  ;;  %v1185_v48 = vpop.f32.mrb[7].mxu0 }
 0x162   :  { %v1207_v49 = vpop.f32.mrb[7].mxu1  ;;  %v741_v50 = vadd.f32 %v1183_v44, %v701_v39 }
 0x164   :  { %v781_v51 = vadd.f32 %v1205_v45, %v741_v50 }
 0x166   :  { %v786_v52 = vmax.f32 %v781_v51, 0.0 }
 0x168   :  { %v787_v53 = vpack.c.bf16 %v786_v52, %v786_v52 }
 0x16a   :  { %1244 = vmatmul.mubr.bf16.vlgmr.msra.gmra.mrb[8].mxu0 %v787_v53 }
 0x23d   :  { %v893_v57 = vpop.f32.mrb[8].mxu0 }
 0x23e   :  { %v894_v58 = vadd.f32 %v1103_v56, %v893_v57  ;;  %v1245_v59 = vpop.f32.mrb[9].mxu0 }
 0x23f   :  { %v896_v60 = vpop.f32.mrb[10].mxu0 }
 0x240   :  { %v899_v61 = vmax.f32 %v894_v58, 0.0  ;;  %v1246_v62 = vpop.f32.mrb[11].mxu0 }
 0x242   :  { %v900_v63 = vpack.c.bf16 %v899_v61, %v899_v61 }
 0x244   :  { %1264 = vmatmul.mubr.bf16.vlgmr.msra.gmra.mrb[8].mxu1 %v900_v63 }
 0x317   :  { %v1006_v1 = vpop.f32.mrb[8].mxu1 }
 0x318   :  { %v1007_v2 = vadd.f32 %v1112_v0, %v1006_v1  ;;  %v1265_v3 = vpop.f32.mrb[9].mxu1 }
 0x319   :  { %v1009_v4 = vpop.f32.mrb[10].mxu1 }
 0x31a   :  { %1012 = vst [vmem:[#allocation10] sm:$0xff] %v1007_v2  ;;  %v1266_v5 = vpop.f32.mrb[11].mxu1 }
 0x31b   :  { %1463 = shalt.err (!%p1460_p8)
}
 0x31c   :  { %s1464_s4 = scalar_lea.hbm %s1622_s5, 128 }
 0x31d   :  { %p1465_p9 = scmp.ne.s32.totalorder %s1622_s5, %s1464_s4  ;;  %p1468_p10 = scmp.lt.u32.totalorder %s1464_s4, %s1622_s5 }
 0x31f   :  { %p1470_p11 = pnand %p1468_p10, %p1465_p9 }
 0x321   :  { %1473 = shalt.err (!%p1470_p11)
}
 0x322   :  { %1022 = dma.vmem_to_hbm [thread:$0]  %s1020_s20, 128, %s1622_s5, [#allocation4]  }
 0x323   :  { %1480 = dma.done.wait [#allocation4], 128  }
 0x324   :  { %1481 = vsyncadd [#allocation4], 4294967168 }
 0x325   :  { %1026 = vsyncpa [#allocation3], 1 }
 0x326   :  { %1027 = vsyncpa [#allocation6], 1 }
 0x327   :  { %1028 = vsyncpa [#allocation9], 1 }
 0x328   :  { %1029 = vsyncpa [#allocation4], 1 }

</bundles_post_ra>
